<compile_context>
chip_gen: v6e
topology: v6e:2x2x1
jax: 0.10.0
libtpu: 0.0.40
codegen_flags: <defaults>
</compile_context>

<pallas_src>
import functools
import math

import jax
import jax.numpy as jnp
from jax.experimental import pallas as pl
from jax.experimental.pallas import tpu as pltpu

LANE = 128
MAX_TILE_ROWS = 2048      # (2048, 128) f32 block = 1 MiB per pipeline buffer
ACC_ROWS = 8              # per-core partial-sum slab (8, 128) == one f32 vreg


def _one_minus_pt_pow(omp, gamma):
    """(1 - p_t) ** gamma, specialized to multiplies for integer gamma."""
    if float(gamma).is_integer() and 0.0 <= float(gamma) <= 16.0:
        g = int(gamma)
        if g == 0:
            return jnp.ones_like(omp)
        r = omp
        for _ in range(g - 1):
            r = r * omp
        return r
    return omp ** jnp.float32(gamma)   # non-integer gamma: pow fallback (EUP)


def _focal_elems(x, t, alpha, gamma):
    """Elementwise focal loss in f32 (numerically-stable BCE-with-logits)."""
    x = x.astype(jnp.float32)
    t = t.astype(jnp.float32)
    # stable BCE with logits: max(x,0) - x*t + log(1 + exp(-|x|))
    bce = jnp.maximum(x, 0.0) - x * t + jnp.log1p(jnp.exp(-jnp.abs(x)))
    p_t = jnp.exp(-bce)
    at = alpha * t + (1.0 - alpha) * (1.0 - t)
    return at * _one_minus_pt_pow(1.0 - p_t, gamma) * bce


def _focal_reduce_kernel(x_ref, t_ref, out_ref, *, alpha, gamma, n_elem,
                         tile_rows, n_chunks, needs_mask):
    c = pl.program_id(0)          # partial-sum / core index  ("parallel")
    i = pl.program_id(1)          # reduction step            ("arbitrary", last)

    @pl.when(i == 0)
    def _():
        out_ref[...] = jnp.zeros_like(out_ref)

    f = _focal_elems(x_ref[...], t_ref[...], alpha, gamma)

    if needs_mask:
        # Zero contributions from (a) lane padding, (b) the ragged last block,
        # (c) duplicate blocks produced by clamping in the index_map.
        # Row-based compare (no *LANE multiply -> no int32 overflow risk).
        blk = c * n_chunks + i                       # logical block index
        row = jax.lax.broadcasted_iota(jnp.int32, f.shape, 0)
        grow = blk * tile_rows + row                 # global 128-lane row index
        full_rows = n_elem // LANE
        rem = n_elem % LANE
        mask = grow < full_rows
        if rem:
            lane = jax.lax.broadcasted_iota(jnp.int32, f.shape, 1)
            mask = mask | ((grow == full_rows) & (lane < rem))
        f = jnp.where(mask, f, 0.0)

    # vreg-wide accumulation (pure VPU adds).  The output block is VMEM-resident
    # across the reduction axis because its index_map ignores `i`.
    if tile_rows % ACC_ROWS == 0:
        out_ref[...] += f.reshape(-1, ACC_ROWS, LANE).sum(axis=0)
    else:
        # Only reachable for tiny inputs (rows < 8): single block, single core.
        out_ref[0:1, :] = out_ref[0:1, :] + jnp.sum(f, axis=0, keepdims=True)


def _focal_elementwise_kernel(x_ref, t_ref, out_ref, *, alpha, gamma):
    out_ref[...] = _focal_elems(x_ref[...], t_ref[...], alpha, gamma).astype(
        out_ref.dtype)


def binary_focal_loss(inputs, targets, alpha=0.25, gamma=2.0, reduction="mean"):
    orig_shape = inputs.shape
    n_elem = int(math.prod(orig_shape))

    flat_x = inputs.reshape(-1)        # metadata-only; keeps original dtype
    flat_t = targets.reshape(-1)

    pad = (-n_elem) % LANE
    if pad:
        # TODO(synk): this lane-alignment pad copies the tensor; it is only hit
        # when numel % 128 != 0 (rare for conv feature maps).
        flat_x = jnp.pad(flat_x, (0, pad))
        flat_t = jnp.pad(flat_t, (0, pad))
    rows = (n_elem + pad) // LANE
    x2 = flat_x.reshape(rows, LANE)
    t2 = flat_t.reshape(rows, LANE)

    tile_rows = rows if rows <= MAX_TILE_ROWS else MAX_TILE_ROWS
    n_blocks = pl.cdiv(rows, tile_rows)

    if reduction in ("mean", "sum"):
        n_cores = 2 if n_blocks >= 2 else 1     # v7x: 2 TCs; harmless on 1-TC chips
        n_chunks = pl.cdiv(n_blocks, n_cores)
        covered = n_cores * n_chunks * tile_rows * LANE
        needs_mask = covered != n_elem
        needs_clamp = (n_cores * n_chunks) != n_blocks

        if needs_clamp:
            def in_map(c, i):
                # Clamp the logical block index; duplicate blocks are zeroed by
                # the in-kernel mask (their logical indices are >= n_elem).
                return (jnp.minimum(c * n_chunks + i, n_blocks - 1), 0)
        else:
            def in_map(c, i):
                return (c * n_chunks + i, 0)

        in_spec = pl.BlockSpec((tile_rows, LANE), in_map)
        kernel = functools.partial(
            _focal_reduce_kernel, alpha=float(alpha), gamma=float(gamma),
            n_elem=n_elem, tile_rows=tile_rows, n_chunks=n_chunks,
            needs_mask=needs_mask)

        partials = pl.pallas_call(
            kernel,
            out_shape=jax.ShapeDtypeStruct((n_cores * ACC_ROWS, LANE),
                                           jnp.float32),
            grid_spec=pltpu.PrefetchScalarGridSpec(
                num_scalar_prefetch=0,
                grid=(n_cores, n_chunks),
                in_specs=[in_spec, in_spec],
                out_specs=pl.BlockSpec((ACC_ROWS, LANE), lambda c, i: (c, 0)),
            ),
            compiler_params=pltpu.CompilerParams(
                dimension_semantics=("parallel", "arbitrary")),
        )(x2, t2)

        total = jnp.sum(partials)                 # <= 2048 floats, trivial
        if reduction == "mean":
            total = total * jnp.float32(1.0 / n_elem)
        return total

    # reduction == 'none' (or anything else, matching the PyTorch `else` branch)
    out_dtype = (inputs.dtype if jnp.issubdtype(inputs.dtype, jnp.floating)
                 else jnp.float32)
    tile_spec = pl.BlockSpec((tile_rows, LANE), lambda i: (i, 0))
    kernel = functools.partial(_focal_elementwise_kernel,
                               alpha=float(alpha), gamma=float(gamma))
    out2 = pl.pallas_call(
        kernel,
        out_shape=jax.ShapeDtypeStruct((rows, LANE), out_dtype),
        grid_spec=pltpu.PrefetchScalarGridSpec(
            num_scalar_prefetch=0,
            grid=(n_blocks,),
            in_specs=[tile_spec, tile_spec],
            out_specs=tile_spec,
        ),
        compiler_params=pltpu.CompilerParams(
            dimension_semantics=("parallel",)),
    )(x2, t2)
    flat = out2.reshape(-1)
    if pad:
        flat = flat[:n_elem]
    return flat.reshape(orig_shape)


def _reference_elems(inputs, targets, alpha=0.25, gamma=2.0):
    x = inputs.astype(jnp.float32)
    t = targets.astype(jnp.float32)
    bce = jnp.maximum(x, 0.0) - x * t + jnp.log1p(jnp.exp(-jnp.abs(x)))
    p_t = jnp.exp(-bce)
    at = alpha * t + (1.0 - alpha) * (1.0 - t)
    return at * (1.0 - p_t) ** gamma * bce


if __name__ == "__main__":
    key = jax.random.PRNGKey(0)
    k1, k2, k3, k4 = jax.random.split(key, 4)

    # Small NCHW case (lane-aligned, single block).
    logits = jax.random.normal(k1, (2, 4, 16, 16), dtype=jnp.float32)
    targets = (jax.random.uniform(k2, (2, 4, 16, 16)) > 0.5).astype(jnp.float32)

    loss = jax.block_until_ready(
        binary_focal_loss(logits, targets, alpha=0.25, gamma=2.0,
                          reduction="mean"))
    ref = jnp.mean(_reference_elems(logits, targets))
    assert jnp.allclose(loss, ref, rtol=1e-5, atol=1e-6), (loss, ref)

    loss_sum = jax.block_until_ready(
        binary_focal_loss(logits, targets, reduction="sum"))
    ref_sum = jnp.sum(_reference_elems(logits, targets))
    assert jnp.allclose(loss_sum, ref_sum, rtol=1e-5, atol=1e-5), (loss_sum, ref_sum)

    per_elem = jax.block_until_ready(
        binary_focal_loss(logits, targets, reduction="none"))
    assert per_elem.shape == logits.shape
    assert jnp.allclose(per_elem, _reference_elems(logits, targets),
                        rtol=1e-5, atol=1e-6)

    # Larger ragged case: exercises multi-block grid, the 2-way parallel split,
    # the clamped duplicate block, and the in-kernel tail mask.
    shape2 = (2, 4, 129, 256)     # 264192 elems -> 2064 rows -> ragged blocks
    logits2 = jax.random.normal(k3, shape2, dtype=jnp.float32)
    targets2 = (jax.random.uniform(k4, shape2) > 0.5).astype(jnp.float32)
    loss2 = jax.block_until_ready(
        binary_focal_loss(logits2, targets2, reduction="mean"))
    ref2 = jnp.mean(_reference_elems(logits2, targets2))
    assert jnp.allclose(loss2, ref2, rtol=1e-4, atol=1e-6), (loss2, ref2)

    # Non-lane-aligned case: exercises the lane-pad path and in-kernel mask.
    shape3 = (3, 5, 7, 11)        # 1155 elems, not a multiple of 128
    logits3 = jax.random.normal(k3, shape3, dtype=jnp.float32)
    targets3 = (jax.random.uniform(k4, shape3) > 0.5).astype(jnp.float32)
    loss3 = jax.block_until_ready(binary_focal_loss(logits3, targets3))
    ref3 = jnp.mean(_reference_elems(logits3, targets3))
    assert jnp.allclose(loss3, ref3, rtol=1e-5, atol=1e-6), (loss3, ref3)

    print("KERNEL_OK")
</pallas_src>

<mosaic_0001>
module attributes {stable_mosaic.version = 11 : i64} {
  func.func @_focal_reduce_kernel(%arg0: i32, %arg1: i32, %arg2: memref<16x128xf32, #tpu.memory_space<vmem>>, %arg3: memref<16x128xf32, #tpu.memory_space<vmem>>, %arg4: memref<8x128xf32, #tpu.memory_space<vmem>>) attributes {dimension_semantics = [#tpu.dimension_semantics<parallel>, #tpu.dimension_semantics<arbitrary>], iteration_bounds = array<i64: 1, 1>, scalar_prefetch = 0 : i64, scratch_operands = 0 : i64, tpu.core_type = #tpu.core_type<tc>, window_params = [{transform_indices = @transform_0, window_bounds = array<i64: 16, 128>}, {transform_indices = @transform_1, window_bounds = array<i64: 16, 128>}, {transform_indices = @transform_2, window_bounds = array<i64: 8, 128>}]} {
    %c0_i32 = arith.constant 0 : i32
    %0 = arith.cmpi eq, %arg1, %c0_i32 : i32
    %1 = arith.extui %0 : i1 to i32
    %c0_i32_0 = arith.constant 0 : i32
    %2 = arith.cmpi ne, %1, %c0_i32_0 : i32
    scf.if %2 {
      %cst_15 = arith.constant 0.000000e+00 : f32
      %35 = vector.broadcast %cst_15 : f32 to vector<8x128xf32>
      %c0_16 = arith.constant 0 : index
      %c0_17 = arith.constant 0 : index
      %36 = vector.load %arg4[%c0_16, %c0_17] : memref<8x128xf32, #tpu.memory_space<vmem>>, vector<8x128xf32>
      tpu.vector_store %arg4[%c0_16, %c0_17], %35 {strides = array<i32>} : memref<8x128xf32, #tpu.memory_space<vmem>>, vector<8x128xf32>,
    } else {
    }
    %c0 = arith.constant 0 : index
    %c0_1 = arith.constant 0 : index
    %3 = vector.load %arg2[%c0, %c0_1] : memref<16x128xf32, #tpu.memory_space<vmem>>, vector<16x128xf32>
    %c0_2 = arith.constant 0 : index
    %c0_3 = arith.constant 0 : index
    %4 = vector.load %arg3[%c0_2, %c0_3] : memref<16x128xf32, #tpu.memory_space<vmem>>, vector<16x128xf32>
    %cst = arith.constant 0.000000e+00 : f32
    %5 = vector.broadcast %cst : f32 to vector<16x128xf32>
    %6 = arith.maximumf %3, %5 : vector<16x128xf32>
    %7 = arith.mulf %3, %4 : vector<16x128xf32>
    %8 = arith.subf %6, %7 : vector<16x128xf32>
    %9 = math.absf %3 : vector<16x128xf32>
    %cst_4 = arith.constant 0.000000e+00 : f32
    %10 = vector.broadcast %cst_4 : f32 to vector<16x128xf32>
    %11 = arith.subf %10, %9 : vector<16x128xf32>
    %12 = math.exp %11 : vector<16x128xf32>
    %13 = math.log1p %12 : vector<16x128xf32>
    %14 = arith.addf %8, %13 : vector<16x128xf32>
    %cst_5 = arith.constant 0.000000e+00 : f32
    %15 = vector.broadcast %cst_5 : f32 to vector<16x128xf32>
    %16 = arith.subf %15, %14 : vector<16x128xf32>
    %17 = math.exp %16 : vector<16x128xf32>
    %cst_6 = arith.constant 2.500000e-01 : f32
    %18 = vector.broadcast %cst_6 : f32 to vector<16x128xf32>
    %19 = arith.mulf %18, %4 : vector<16x128xf32>
    %cst_7 = arith.constant 1.000000e+00 : f32
    %20 = vector.broadcast %cst_7 : f32 to vector<16x128xf32>
    %21 = arith.subf %20, %4 : vector<16x128xf32>
    %cst_8 = arith.constant 7.500000e-01 : f32
    %22 = vector.broadcast %cst_8 : f32 to vector<16x128xf32>
    %23 = arith.mulf %22, %21 : vector<16x128xf32>
    %24 = arith.addf %19, %23 : vector<16x128xf32>
    %cst_9 = arith.constant 1.000000e+00 : f32
    %25 = vector.broadcast %cst_9 : f32 to vector<16x128xf32>
    %26 = arith.subf %25, %17 : vector<16x128xf32>
    %27 = arith.mulf %26, %26 : vector<16x128xf32>
    %28 = arith.mulf %24, %27 : vector<16x128xf32>
    %29 = arith.mulf %28, %14 : vector<16x128xf32>
    %c0_10 = arith.constant 0 : index
    %c0_11 = arith.constant 0 : index
    %30 = vector.load %arg4[%c0_10, %c0_11] : memref<8x128xf32, #tpu.memory_space<vmem>>, vector<8x128xf32>
    %31 = vector.shape_cast %29 : vector<16x128xf32> to vector<2x8x128xf32>
    %cst_12 = arith.constant dense<0.000000e+00> : vector<8x128xf32>
    %32 = vector.multi_reduction <add>, %31, %cst_12 [0] : vector<2x8x128xf32> to vector<8x128xf32>
    %33 = arith.addf %30, %32 : vector<8x128xf32>
    %c0_13 = arith.constant 0 : index
    %c0_14 = arith.constant 0 : index
    %34 = vector.load %arg4[%c0_13, %c0_14] : memref<8x128xf32, #tpu.memory_space<vmem>>, vector<8x128xf32>
    tpu.vector_store %arg4[%c0_13, %c0_14], %33 {strides = array<i32>} : memref<8x128xf32, #tpu.memory_space<vmem>>, vector<8x128xf32>,
    return
  }
  func.func @transform_0(%arg0: i32, %arg1: i32) -> (i32, i32) {
    %c1_i32 = arith.constant 1 : i32
    %0 = arith.muli %arg0, %c1_i32 : i32
    %1 = arith.addi %0, %arg1 : i32
    %c0_i32 = arith.constant 0 : i32
    %c0_i32_0 = arith.constant 0 : i32
    return %1, %c0_i32 : i32, i32
  }
  func.func @transform_1(%arg0: i32, %arg1: i32) -> (i32, i32) {
    %c1_i32 = arith.constant 1 : i32
    %0 = arith.muli %arg0, %c1_i32 : i32
    %1 = arith.addi %0, %arg1 : i32
    %c0_i32 = arith.constant 0 : i32
    %c0_i32_0 = arith.constant 0 : i32
    return %1, %c0_i32 : i32, i32
  }
  func.func @transform_2(%arg0: i32, %arg1: i32) -> (i32, i32) {
    %c0_i32 = arith.constant 0 : i32
    %c0_i32_0 = arith.constant 0 : i32
    return %arg0, %c0_i32 : i32, i32
  }
}

</mosaic_0001>

<bundles_post_ra>
// kernel: tpu_custom_call.1
= control target key start
LH: loop header
LB: loop body
LE: loop exit
PB: predicated region body
PF: predicated region fallthrough
CT: control target
= control target key end

     0   :  { %7 = vsyncpa [#allocation3], 0  ;;  %s250_s0 = inlined_call_operand.hbm [shape: f32[16,128], index: 0, kind: input, shape index: {}]   ;;  %s251_s1 = inlined_call_operand.hbm [shape: f32[16,128], index: 1, kind: input, shape index: {}]   ;;  %s252_s2 = inlined_call_operand.hbm [shape: f32[8,128], index: 2, kind: output, shape index: {}]  }
   0x1   :  { %8 = vsyncpa [#allocation6], 0 }
   0x2   :  { %9 = vsyncpa [#allocation4], 0  ;;  %s221_s9 = smov [#allocation2]  }
   0x3   :  { %s19_s10 = sshll.u32 %s221_s9, 4  ;;  %s20_s10 = int_to_ptr.vmem [resolvable:$true] %s19_s10 }
   0x4   :  { %s163_s11 = scalar_lea.vmem %s20_s10, 256  ;;  %p168_p1 = scmp.lt.s32.totalorder %s20_s10, %s20_s10 }
   0x5   :  { %p164_p0 = scmp.ne.s32.totalorder %s20_s10, %s163_s11  ;;  %p169_p2 = scmp.lt.s32.totalorder %s163_s11, %s163_s11 }
   0x7   :  { %p170_p3 = por %p169_p2, %p168_p1 }
   0x9   :  { %p171_p4 = pnand %p170_p3, %p164_p0 }
   0xb   :  { %174 = shalt.err (!%p171_p4)
}
   0xc   :  { %s222_s12 = smov 128   ;;  %s223_s13 = smov 8  }
   0xd   :  { %25 = dma.hbm_to_vmem [thread:$0]  %s250_s0, 256, %s20_s10, [#allocation3], %s222_s12, %s222_s12, %s223_s13  }
   0xe   :  { %s224_s16 = smov [#allocation5]  }
   0xf   :  { %s35_s17 = sshll.u32 %s224_s16, 4  ;;  %s36_s17 = int_to_ptr.vmem [resolvable:$true] %s35_s17 }
  0x10   :  { %s183_s18 = scalar_lea.vmem %s36_s17, 256  ;;  %p188_p6 = scmp.lt.s32.totalorder %s36_s17, %s36_s17 }
  0x11   :  { %p184_p5 = scmp.ne.s32.totalorder %s36_s17, %s183_s18  ;;  %p189_p7 = scmp.lt.s32.totalorder %s183_s18, %s183_s18 }
  0x13   :  { %p190_p8 = por %p189_p7, %p188_p6 }
  0x15   :  { %p191_p9 = pnand %p190_p8, %p184_p5 }
  0x17   :  { %194 = shalt.err (!%p191_p9)
}
  0x18   :  { %41 = dma.hbm_to_vmem [thread:$0]  %s251_s1, 256, %s36_s17, [#allocation6], %s222_s12, %s222_s12, %s223_s13  }
  0x19   :  { %215 = dma.done.wait [#allocation3], 256  }
  0x1a   :  { %216 = vsyncadd [#allocation3], 4294967040 }
  0x1b   :  { %217 = dma.done.wait [#allocation6], 256  }
  0x1c   :  { %218 = vsyncadd [#allocation6], 4294967040  ;;  %v57_v0 = vld [vmem:[#allocation2] sm:$0xff]  ;;  %v58_v1 = vld [vmem:[#allocation2 + $0x8] sm:$0xff]  ;;  %s225_s0 = smov [#allocation7]  }
  0x1d   :  { %v67_v2 = vand.u32 2147483647, %v57_v0  ;;  %v68_v3 = vand.u32 2147483647, %v58_v1  ;;  %v59_v14 = vld [vmem:[#allocation5] sm:$0xff]  ;;  %v60_v15 = vld [vmem:[#allocation5 + $0x8] sm:$0xff] }
  0x1e   :  { %v61_v17 = vmax.f32 %v57_v0, 0.0  ;;  %v63_v18 = vmul.f32 %v59_v14, %v57_v0  ;;  %v62_v21 = vmax.f32 %v58_v1, 0.0  ;;  %v64_v22 = vmul.f32 %v60_v15, %v58_v1  ;;  %s127_s1 = sshll.u32 %s225_s0, 4  ;;  %s128_s1 = int_to_ptr.vmem [resolvable:$true] %s127_s1 }
  0x1f   :  { %v69_v4 = vsub.f32 0.0, %v67_v2  ;;  %v70_v5 = vsub.f32 0.0, %v68_v3  ;;  %v103_v40 = vsub.f32 1.0, %v59_v14  ;;  %v104_v41 = vsub.f32 1.0, %v60_v15  ;;  %s195_s21 = scalar_lea.vmem %s128_s1, 128  ;;  %p200_p11 = scmp.lt.s32.totalorder %s128_s1, %s128_s1 }
  0x20   :  { %v65_v26 = vsub.f32 %v61_v17, %v63_v18  ;;  %v66_v29 = vsub.f32 %v62_v21, %v64_v22  ;;  %v101_v42 = vmul.f32 0.25, %v59_v14  ;;  %v102_v44 = vmul.f32 0.25, %v60_v15  ;;  %p196_p10 = scmp.ne.s32.totalorder %s128_s1, %s195_s21  ;;  %p201_p12 = scmp.lt.s32.totalorder %s195_s21, %s195_s21 }
  0x21   :  { %v71_v6 = vmul.f32 1.442695, %v69_v4  ;;  %v73_v7 = vmul.f32 1.442695, %v70_v5  ;;  %v105_v43 = vmul.f32 0.75, %v103_v40  ;;  %v106_v45 = vmul.f32 0.75, %v104_v41 }
  0x22   :  { %p202_p13 = por %p201_p12, %p200_p11 }
  0x23   :  { %143 = vpow2.f32 %v71_v6  ;;  %v107_v48 = vadd.f32 %v105_v43, %v101_v42  ;;  %v108_v50 = vadd.f32 %v106_v45, %v102_v44 }
  0x24   :  { %145 = vpow2.f32 %v73_v7  ;;  %p203_p0 = pnand %p202_p13, %p196_p10 }
  0x30   :  { %v144_v8 = vpop.eup %143 }
  0x31   :  { %v146_v9 = vpop.eup %145  ;;  %v75_v10 = vadd.f32 1.0, %v144_v8  ;;  %v78_v12 = vmul.f32 -0.5, %v144_v8  ;;  %v81_v19 = vand.u32 2147483647, %v144_v8 }
  0x32   :  { %v84_v11 = vadd.f32 1.0, %v146_v9  ;;  %v87_v13 = vmul.f32 -0.5, %v146_v9  ;;  %v90_v23 = vand.u32 2147483647, %v146_v9 }
  0x33   :  { %147 = vlog2.f32 %v75_v10  ;;  %v79_v16 = vadd.f32 1.0, %v78_v12  ;;  %vm82_vm0 = vcmp.lt.f32.partialorder %v81_v19, 0.0004427343 }
  0x34   :  { %149 = vlog2.f32 %v84_v11  ;;  %v88_v20 = vadd.f32 1.0, %v87_v13  ;;  %vm91_vm1 = vcmp.lt.f32.partialorder %v90_v23, 0.0004427343 }
  0x35   :  { %v80_v24 = vmul.f32 %v144_v8, %v79_v16 }
  0x36   :  { %v89_v27 = vmul.f32 %v146_v9, %v88_v20 }
  0x40   :  { %v148_v25 = vpop.eup %147 }
  0x41   :  { %v150_v28 = vpop.eup %149  ;;  %v77_v30 = vmul.f32 0.6931472, %v148_v25 }
  0x42   :  { %v86_v31 = vmul.f32 0.6931472, %v150_v28 }
  0x43   :  { %v83_v32 = vsel %vm82_vm0, %v80_v24, %v77_v30 }
  0x44   :  { %v92_v33 = vsel %vm91_vm1, %v89_v27, %v86_v31  ;;  %v93_v34 = vadd.f32 %v83_v32, %v65_v26 }
  0x45   :  { %v94_v35 = vadd.f32 %v92_v33, %v66_v29 }
  0x46   :  { %v95_v36 = vsub.f32 0.0, %v93_v34 }
  0x47   :  { %v96_v37 = vsub.f32 0.0, %v94_v35 }
  0x48   :  { %v97_v38 = vmul.f32 1.442695, %v95_v36 }
  0x49   :  { %v99_v39 = vmul.f32 1.442695, %v96_v37 }
  0x4a   :  { %151 = vpow2.f32 %v97_v38 }
  0x4b   :  { %153 = vpow2.f32 %v99_v39 }
  0x57   :  { %v152_v46 = vpop.eup %151 }
  0x58   :  { %v154_v47 = vpop.eup %153  ;;  %v109_v49 = vsub.f32 1.0, %v152_v46 }
  0x59   :  { %v110_v51 = vsub.f32 1.0, %v154_v47 }
  0x5a   :  { %v111_v52 = vmul.f32 %v109_v49, %v109_v49 }
  0x5b   :  { %v112_v53 = vmul.f32 %v110_v51, %v110_v51 }
  0x5c   :  { %v113_v54 = vmul.f32 %v111_v52, %v107_v48 }
  0x5d   :  { %v114_v55 = vmul.f32 %v112_v53, %v108_v50 }
  0x5e   :  { %v115_v56 = vmul.f32 %v113_v54, %v93_v34 }
  0x5f   :  { %v116_v57 = vmul.f32 %v114_v55, %v94_v35 }
  0x61   :  { %v118_v58 = vadd.f32 %v116_v57, %v115_v56 }
  0x63   :  { %120 = vst [vmem:[#allocation7] sm:$0xff] %v118_v58 }
  0x64   :  { %206 = shalt.err (!%p203_p0)
}
  0x65   :  { %130 = dma.vmem_to_hbm [thread:$0]  %s128_s1, 128, %s252_s2, [#allocation4]  }
  0x66   :  { %219 = dma.done.wait [#allocation4], 128  }
  0x67   :  { %220 = vsyncadd [#allocation4], 4294967168 }
  0x68   :  { %134 = vsyncpa [#allocation3], 1 }
  0x69   :  { %135 = vsyncpa [#allocation6], 1 }
  0x6a   :  { %136 = vsyncpa [#allocation4], 1 }

</bundles_post_ra>
